<compile_context>
chip_gen: v7x
topology: tpu7x:2x2x1
jax: 0.10.0
libtpu: 0.0.40
codegen_flags: <defaults>
</compile_context>

<pallas_src>
import functools

import jax
import jax.numpy as jnp
from jax.experimental import pallas as pl
from jax.experimental.pallas import tpu as pltpu

LANES = 128
MAX_BLOCK_ROWS = 2048   # 2048 x 128 x f32 = 1 MiB per input block
N_SPLIT = 2             # outer "parallel" axis (megacore split on v7x)


def _cdiv(a, b):
    return (a + b - 1) // b


def _round_up(a, b):
    return _cdiv(a, b) * b


def _sublane_mult(dtype):
    # second-minor tiling multiple: 8 for 4-byte, 16 for 2-byte, 32 for 1-byte
    return {4: 8, 2: 16, 1: 32}.get(jnp.dtype(dtype).itemsize, 8)


def _loss_sums_kernel(pred_ref, label_ref, sq_ref, ab_ref, *,
                      block_rows, bps, valid_rows, needs_mask):
    """Accumulate per-lane partial sums of (p-l)^2 and |p-l| for one split."""
    i = pl.program_id(1)

    @pl.when(i == 0)
    def _():
        sq_ref[...] = jnp.zeros_like(sq_ref)
        ab_ref[...] = jnp.zeros_like(ab_ref)

    # Cast in VMEM (inputs are DMA'd in their native dtype).
    d = pred_ref[...].astype(jnp.float32) - label_ref[...].astype(jnp.float32)

    if needs_mask:
        # Mask rows past the true row count (ragged tail and/or clamped
        # duplicate blocks of the split).  Cheap VPU select, mem-bound kernel.
        bid = pl.program_id(0) * bps + i
        row = bid * block_rows + jax.lax.broadcasted_iota(jnp.int32, d.shape, 0)
        d = jnp.where(row < valid_rows, d, 0.0)

    # Per-lane accumulation only; full scalar reduce happens outside.
    sq_ref[...] += jnp.sum(d * d, axis=0, keepdims=True)
    ab_ref[...] += jnp.sum(jnp.abs(d), axis=0, keepdims=True)


@jax.jit
def _pair_reduction_sums(pred, label):
    """Pallas-computed (sum((p-l)^2), sum(|p-l|)) over all elements."""
    n = pred.size
    p = pred.reshape(-1)
    l = label.reshape(-1)

    # Only a tiny lane-alignment pad (<=127 elems), and only when needed.
    lane_pad = (-n) % LANES
    if lane_pad:
        p = jnp.pad(p, (0, lane_pad))
        l = jnp.pad(l, (0, lane_pad))
    rows = (n + lane_pad) // LANES
    p2 = p.reshape(rows, LANES)
    l2 = l.reshape(rows, LANES)

    mult = max(_sublane_mult(pred.dtype), _sublane_mult(label.dtype))
    block_rows = min(MAX_BLOCK_ROWS, _round_up(rows, mult))
    total_blocks = _cdiv(rows, block_rows)
    n_split = min(N_SPLIT, total_blocks)
    bps = _cdiv(total_blocks, n_split)          # blocks per split
    needs_mask = (n_split * bps * block_rows) != rows

    if n_split * bps == total_blocks:
        def idx_map(s, i):
            return (s * bps + i, 0)
    else:
        # Clamp so duplicate/overhanging blocks DMA in-bounds data; their
        # contribution is zeroed by the in-kernel row mask.
        def idx_map(s, i):
            return (jnp.minimum(s * bps + i, total_blocks - 1), 0)

    kernel = functools.partial(
        _loss_sums_kernel,
        block_rows=block_rows, bps=bps,
        valid_rows=rows, needs_mask=needs_mask)

    sq_part, ab_part = pl.pallas_call(
        kernel,
        out_shape=(jax.ShapeDtypeStruct((n_split, 1, LANES), jnp.float32),
                   jax.ShapeDtypeStruct((n_split, 1, LANES), jnp.float32)),
        grid_spec=pltpu.PrefetchScalarGridSpec(
            num_scalar_prefetch=0,
            grid=(n_split, bps),
            in_specs=[
                pl.BlockSpec((block_rows, LANES), idx_map),
                pl.BlockSpec((block_rows, LANES), idx_map),
            ],
            out_specs=(
                pl.BlockSpec((None, 1, LANES), lambda s, i: (s, 0, 0)),
                pl.BlockSpec((None, 1, LANES), lambda s, i: (s, 0, 0)),
            ),
        ),
        compiler_params=pltpu.CompilerParams(
            dimension_semantics=("parallel", "arbitrary")),
    )(p2, l2)

    # Tiny final reduce (n_split x 128 lanes each) outside the kernel.
    return jnp.sum(sq_part), jnp.sum(ab_part)


def make_mse_criterion(key):
    """MSELoss(reduction='mean') applied to entry `key` of the dicts."""
    def crit(pred_dict, label_dict):
        sq, _ = _pair_reduction_sums(pred_dict[key], label_dict[key])
        return sq / jnp.float32(pred_dict[key].size)
    return crit


def make_l1_criterion(key):
    """L1Loss(reduction='mean') applied to entry `key` of the dicts."""
    def crit(pred_dict, label_dict):
        _, ab = _pair_reduction_sums(pred_dict[key], label_dict[key])
        return ab / jnp.float32(pred_dict[key].size)
    return crit


class PreApplyCriterionListDict:
    """JAX/Pallas port of the PyTorch wrapper (identical forward semantics)."""

    def __init__(self, criterions_single, sum_losses=True, loss_weights=None):
        self.criterions_single = criterions_single
        self.sum_losses = sum_losses
        self.loss_weights = loss_weights

    def __call__(self, pred_dict, label_dict):
        losslist = []
        for criterion_idx, criterion_single in enumerate(self.criterions_single):
            loss_i = criterion_single(pred_dict, label_dict)
            if self.loss_weights is not None:
                loss_i = loss_i * self.loss_weights[criterion_idx]
            losslist.append(loss_i)
        if self.sum_losses:
            return sum(losslist)
        else:
            return losslist
        # TODO(synk): cross-key fusion (one pallas_call streaming every dict
        # entry once) requires knowledge of the opaque criterion callables; the
        # per-pair kernel already fuses both reductions into a single HBM pass.


if __name__ == "__main__":
    key = jax.random.PRNGKey(0)
    k1, k2, k3, k4 = jax.random.split(key, 4)

    # Small NCHW-shaped dict entries (batch=2, channels=4, spatial=16).
    pred_dict = {
        "seg":   jax.random.normal(k1, (2, 4, 16, 16), dtype=jnp.float32),
        "depth": jax.random.normal(k2, (2, 4, 16, 16), dtype=jnp.float32),
    }
    label_dict = {
        "seg":   jax.random.normal(k3, (2, 4, 16, 16), dtype=jnp.float32),
        "depth": jax.random.normal(k4, (2, 4, 16, 16), dtype=jnp.float32),
    }

    criterions = [make_mse_criterion("seg"), make_l1_criterion("depth")]
    loss_weights = [0.5, 2.0]

    module = PreApplyCriterionListDict(
        criterions, sum_losses=True, loss_weights=loss_weights)

    total = module(pred_dict, label_dict)
    total = jax.block_until_ready(total)

    # Pure-JAX reference for the exact same forward semantics.
    ref_mse = jnp.mean((pred_dict["seg"] - label_dict["seg"]) ** 2)
    ref_l1 = jnp.mean(jnp.abs(pred_dict["depth"] - label_dict["depth"]))
    ref_total = loss_weights[0] * ref_mse + loss_weights[1] * ref_l1

    assert jnp.allclose(total, ref_total, rtol=1e-5, atol=1e-5), (total, ref_total)

    # Also exercise sum_losses=False / no weights branch.
    module_list = PreApplyCriterionListDict(criterions, sum_losses=False)
    losses = jax.block_until_ready(module_list(pred_dict, label_dict))
    assert len(losses) == 2
    assert jnp.allclose(losses[0], ref_mse, rtol=1e-5, atol=1e-5)
    assert jnp.allclose(losses[1], ref_l1, rtol=1e-5, atol=1e-5)

    # Exercise the multi-block / masked / split path with a larger, ragged size
    # (rows not a multiple of the block, odd block count across the 2 splits).
    kb1, kb2 = jax.random.split(k1)
    big_p = jax.random.normal(kb1, (3, 5, 123, 97), dtype=jnp.float32)
    big_l = jax.random.normal(kb2, (3, 5, 123, 97), dtype=jnp.float32)
    sq, ab = jax.block_until_ready(_pair_reduction_sums(big_p, big_l))
    ref_sq = jnp.sum((big_p - big_l) ** 2)
    ref_ab = jnp.sum(jnp.abs(big_p - big_l))
    assert jnp.allclose(sq, ref_sq, rtol=1e-4, atol=1e-3), (sq, ref_sq)
    assert jnp.allclose(ab, ref_ab, rtol=1e-4, atol=1e-3), (ab, ref_ab)

    print("KERNEL_OK")
</pallas_src>

<mosaic_0001>
module attributes {stable_mosaic.version = 11 : i64} {
  func.func @_loss_sums_kernel(%arg0: i32, %arg1: i32, %arg2: memref<16x128xf32, #tpu.memory_space<vmem>>, %arg3: memref<16x128xf32, #tpu.memory_space<vmem>>, %arg4: memref<1x1x128xf32, #tpu.memory_space<vmem>>, %arg5: memref<1x1x128xf32, #tpu.memory_space<vmem>>) attributes {dimension_semantics = [#tpu.dimension_semantics<parallel>, #tpu.dimension_semantics<arbitrary>], iteration_bounds = array<i64: 1, 1>, scalar_prefetch = 0 : i64, scratch_operands = 0 : i64, tpu.core_type = #tpu.core_type<tc>, window_params = [{transform_indices = @transform_0, window_bounds = array<i64: 16, 128>}, {transform_indices = @transform_1, window_bounds = array<i64: 16, 128>}, {transform_indices = @transform_2, window_bounds = array<i64: 1, 1, 128>}, {transform_indices = @transform_3, window_bounds = array<i64: 1, 1, 128>}]} {
    %c0_i32 = arith.constant 0 : i32
    %0 = arith.cmpi eq, %arg1, %c0_i32 : i32
    %1 = arith.extui %0 : i1 to i32
    %c0_i32_0 = arith.constant 0 : i32
    %2 = arith.cmpi ne, %1, %c0_i32_0 : i32
    scf.if %2 {
      %cst_17 = arith.constant 0.000000e+00 : f32
      %24 = vector.broadcast %cst_17 : f32 to vector<1x128xf32>
      %c0_18 = arith.constant 0 : index
      %c0_19 = arith.constant 0 : index
      %c0_20 = arith.constant 0 : index
      %25 = vector.load %arg4[%c0_18, %c0_19, %c0_20] : memref<1x1x128xf32, #tpu.memory_space<vmem>>, vector<1x1x128xf32>
      %26 = vector.shape_cast %25 : vector<1x1x128xf32> to vector<1x128xf32>
      %27 = vector.shape_cast %24 : vector<1x128xf32> to vector<1x1x128xf32>
      tpu.vector_store %arg4[%c0_18, %c0_19, %c0_20], %27 {strides = array<i32>} : memref<1x1x128xf32, #tpu.memory_space<vmem>>, vector<1x1x128xf32>,
      %cst_21 = arith.constant 0.000000e+00 : f32
      %28 = vector.broadcast %cst_21 : f32 to vector<1x128xf32>
      %c0_22 = arith.constant 0 : index
      %c0_23 = arith.constant 0 : index
      %c0_24 = arith.constant 0 : index
      %29 = vector.load %arg5[%c0_22, %c0_23, %c0_24] : memref<1x1x128xf32, #tpu.memory_space<vmem>>, vector<1x1x128xf32>
      %30 = vector.shape_cast %29 : vector<1x1x128xf32> to vector<1x128xf32>
      %31 = vector.shape_cast %28 : vector<1x128xf32> to vector<1x1x128xf32>
      tpu.vector_store %arg5[%c0_22, %c0_23, %c0_24], %31 {strides = array<i32>} : memref<1x1x128xf32, #tpu.memory_space<vmem>>, vector<1x1x128xf32>,
    } else {
    }
    %c0 = arith.constant 0 : index
    %c0_1 = arith.constant 0 : index
    %3 = vector.load %arg2[%c0, %c0_1] : memref<16x128xf32, #tpu.memory_space<vmem>>, vector<16x128xf32>
    %c0_2 = arith.constant 0 : index
    %c0_3 = arith.constant 0 : index
    %4 = vector.load %arg3[%c0_2, %c0_3] : memref<16x128xf32, #tpu.memory_space<vmem>>, vector<16x128xf32>
    %5 = arith.subf %3, %4 : vector<16x128xf32>
    %c0_4 = arith.constant 0 : index
    %c0_5 = arith.constant 0 : index
    %c0_6 = arith.constant 0 : index
    %6 = vector.load %arg4[%c0_4, %c0_5, %c0_6] : memref<1x1x128xf32, #tpu.memory_space<vmem>>, vector<1x1x128xf32>
    %7 = vector.shape_cast %6 : vector<1x1x128xf32> to vector<1x128xf32>
    %8 = arith.mulf %5, %5 : vector<16x128xf32>
    %cst = arith.constant dense<0.000000e+00> : vector<128xf32>
    %9 = vector.multi_reduction <add>, %8, %cst [0] : vector<16x128xf32> to vector<128xf32>
    %10 = vector.shape_cast %9 : vector<128xf32> to vector<1x128xf32>
    %11 = arith.addf %7, %10 : vector<1x128xf32>
    %c0_7 = arith.constant 0 : index
    %c0_8 = arith.constant 0 : index
    %c0_9 = arith.constant 0 : index
    %12 = vector.load %arg4[%c0_7, %c0_8, %c0_9] : memref<1x1x128xf32, #tpu.memory_space<vmem>>, vector<1x1x128xf32>
    %13 = vector.shape_cast %12 : vector<1x1x128xf32> to vector<1x128xf32>
    %14 = vector.shape_cast %11 : vector<1x128xf32> to vector<1x1x128xf32>
    tpu.vector_store %arg4[%c0_7, %c0_8, %c0_9], %14 {strides = array<i32>} : memref<1x1x128xf32, #tpu.memory_space<vmem>>, vector<1x1x128xf32>,
    %c0_10 = arith.constant 0 : index
    %c0_11 = arith.constant 0 : index
    %c0_12 = arith.constant 0 : index
    %15 = vector.load %arg5[%c0_10, %c0_11, %c0_12] : memref<1x1x128xf32, #tpu.memory_space<vmem>>, vector<1x1x128xf32>
    %16 = vector.shape_cast %15 : vector<1x1x128xf32> to vector<1x128xf32>
    %17 = math.absf %5 : vector<16x128xf32>
    %cst_13 = arith.constant dense<0.000000e+00> : vector<128xf32>
    %18 = vector.multi_reduction <add>, %17, %cst_13 [0] : vector<16x128xf32> to vector<128xf32>
    %19 = vector.shape_cast %18 : vector<128xf32> to vector<1x128xf32>
    %20 = arith.addf %16, %19 : vector<1x128xf32>
    %c0_14 = arith.constant 0 : index
    %c0_15 = arith.constant 0 : index
    %c0_16 = arith.constant 0 : index
    %21 = vector.load %arg5[%c0_14, %c0_15, %c0_16] : memref<1x1x128xf32, #tpu.memory_space<vmem>>, vector<1x1x128xf32>
    %22 = vector.shape_cast %21 : vector<1x1x128xf32> to vector<1x128xf32>
    %23 = vector.shape_cast %20 : vector<1x128xf32> to vector<1x1x128xf32>
    tpu.vector_store %arg5[%c0_14, %c0_15, %c0_16], %23 {strides = array<i32>} : memref<1x1x128xf32, #tpu.memory_space<vmem>>, vector<1x1x128xf32>,
    return
  }
  func.func @transform_0(%arg0: i32, %arg1: i32) -> (i32, i32) {
    %c1_i32 = arith.constant 1 : i32
    %0 = arith.muli %arg0, %c1_i32 : i32
    %1 = arith.addi %0, %arg1 : i32
    %c0_i32 = arith.constant 0 : i32
    %c0_i32_0 = arith.constant 0 : i32
    return %1, %c0_i32 : i32, i32
  }
  func.func @transform_1(%arg0: i32, %arg1: i32) -> (i32, i32) {
    %c1_i32 = arith.constant 1 : i32
    %0 = arith.muli %arg0, %c1_i32 : i32
    %1 = arith.addi %0, %arg1 : i32
    %c0_i32 = arith.constant 0 : i32
    %c0_i32_0 = arith.constant 0 : i32
    return %1, %c0_i32 : i32, i32
  }
  func.func @transform_2(%arg0: i32, %arg1: i32) -> (i32, i32, i32) {
    %c0_i32 = arith.constant 0 : i32
    %c0_i32_0 = arith.constant 0 : i32
    %c0_i32_1 = arith.constant 0 : i32
    return %arg0, %c0_i32, %c0_i32_0 : i32, i32, i32
  }
  func.func @transform_3(%arg0: i32, %arg1: i32) -> (i32, i32, i32) {
    %c0_i32 = arith.constant 0 : i32
    %c0_i32_0 = arith.constant 0 : i32
    %c0_i32_1 = arith.constant 0 : i32
    return %arg0, %c0_i32, %c0_i32_0 : i32, i32, i32
  }
}

</mosaic_0001>

<bundles_post_ra>
// kernel: _pair_reduction_sums.1
= control target key start
LH: loop header
LB: loop body
LE: loop exit
PB: predicated region body
PF: predicated region fallthrough
CT: control target
= control target key end

     0   :  { %v114_v0 = vmov 0.0   ;;  %s165_s2 = inlined_call_operand.vmem [shape: f32[1,1,128], index: 2, kind: output, shape index: {0}]   ;;  %s166_s3 = inlined_call_operand.vmem [shape: f32[1,1,128], index: 3, kind: output, shape index: {1}]   ;;  %s167_s0 = inlined_call_operand.vmem [shape: f32[16,128], index: 0, kind: input, shape index: {}]   ;;  %s168_s1 = inlined_call_operand.vmem [shape: f32[16,128], index: 1, kind: input, shape index: {}]  }
   0x1   :  { %61 = vst [vmem:[%s165_s2] sm:$0x1] %v114_v0  ;;  %62 = vst [vmem:[%s166_s3] sm:$0x1] %v114_v0  ;;  %v63_v1 = vld [vmem:[%s167_s0] sm:$0xff]  ;;  %v64_v2 = vld [vmem:[%s167_s0 + $0x8] sm:$0xff] }
   0x2   :  { %v65_v3 = vld [vmem:[%s168_s1] sm:$0xff]  ;;  %v66_v4 = vld [vmem:[%s168_s1 + $0x8] sm:$0xff] }
   0x3   :  { %v67_v5 = vsub.f32 %v63_v1, %v65_v3  ;;  %v68_v6 = vsub.f32 %v64_v2, %v66_v4 }
   0x5   :  { %v70_v7 = vmul.f32 %v67_v5, %v67_v5  ;;  %v82_v8 = vand.u32 2147483647, %v67_v5  ;;  %v71_v9 = vmul.f32 %v68_v6, %v68_v6  ;;  %v83_v10 = vand.u32 2147483647, %v68_v6 }
   0x7   :  { %v72_v11 = vadd.f32 %v71_v9, %v70_v7  ;;  %v84_v12 = vadd.f32 %v83_v10, %v82_v8 }
   0x8   :  { %v69_v23 = vld [vmem:[%s165_s2] sm:$0x1] }
   0x9   :  { %v73_v13 = vrot.slane %v72_v11, 4  ;;  %v85_v14 = vrot.slane %v84_v12, 4  ;;  %v81_v24 = vld [vmem:[%s166_s3] sm:$0x1] }
   0xb   :  { %v74_v15 = vadd.f32 %v73_v13, %v72_v11  ;;  %v86_v16 = vadd.f32 %v85_v14, %v84_v12 }
   0xd   :  { %v75_v17 = vrot.slane %v74_v15, 2  ;;  %v87_v18 = vrot.slane %v86_v16, 2 }
   0xf   :  { %v76_v19 = vadd.f32 %v75_v17, %v74_v15  ;;  %v88_v20 = vadd.f32 %v87_v18, %v86_v16 }
  0x11   :  { %v77_v21 = vrot.slane %v76_v19, 1  ;;  %v89_v22 = vrot.slane %v88_v20, 1 }
  0x13   :  { %v78_v25 = vadd.f32 %v77_v21, %v76_v19  ;;  %v90_v26 = vadd.f32 %v89_v22, %v88_v20 }
  0x15   :  { %v79_v27 = vadd.f32 %v78_v25, %v69_v23  ;;  %v91_v28 = vadd.f32 %v90_v26, %v81_v24 }
  0x17   :  { %80 = vst [vmem:[%s165_s2] sm:$0x1] %v79_v27  ;;  %92 = vst [vmem:[%s166_s3] sm:$0x1] %v91_v28 }

</bundles_post_ra>
